<compile_context>
chip_gen: v5e
topology: v5e:2x2
jax: 0.10.0
libtpu: 0.0.40
codegen_flags: <defaults>
</compile_context>

<pallas_src>
import functools

import jax
import jax.numpy as jnp
from jax import lax
from jax.experimental import pallas as pl
from jax.experimental.pallas import tpu as pltpu

# Hidden widths fixed by the PyTorch module.
H1, H2 = 10, 15
HP = 16  # 8-row-aligned padded hidden width used for in-kernel slices.

# Row offsets inside the packed parameter slab (16-row, zero-padded regions).
R_W1, R_W2, R_W3, R_B1, R_B2, R_B3 = 0, 16, 32, 48, 64, 80
SLAB_ROWS = 88  # 81 rows used, padded up to a multiple of 8.

TB_MAX = 8192   # max batch tile (lanes of the transposed compute)


def _round_up(n, m):
    return ((n + m - 1) // m) * m


def house_predict_kernel(x_ref, p_ref, o_ref, *, F):
    """x_ref: (TB, F) batch-major tile, p_ref: (SLAB_ROWS, C), o_ref: (1, TB)."""
    x = x_ref[...]                                              # (TB, F)

    # Linear(F, 10) + ReLU, computed transposed: W1^T @ x^T expressed as a
    # dot_general contracting F on both operands (same pattern as q @ k^T).
    # Slab rows 10..15 are zero, so padded rows of h1 come out exactly zero.
    w1t = p_ref[R_W1:R_W1 + HP, 0:F]                            # (16, F)
    b1 = p_ref[R_B1:R_B1 + HP, 0:1]                             # (16, 1)
    h1 = lax.dot_general(w1t, x, (((1,), (1,)), ((), ())),
                         preferred_element_type=jnp.float32)    # (16, TB)
    h1 = jnp.maximum(h1 + b1, 0.0)

    # Dropout(0.2): inference/eval mode -> identity (PyTorch eval semantics).
    # TODO(synk): training-mode dropout (mask + 1/(1-p) scale) not implemented.

    # Linear(10, 15) + ReLU (8-aligned zero-padded 16x16 view; bit-identical).
    w2t = p_ref[R_W2:R_W2 + HP, 0:HP]                           # (16, 16)
    b2 = p_ref[R_B2:R_B2 + HP, 0:1]                             # (16, 1)
    h2 = jnp.dot(w2t, h1, preferred_element_type=jnp.float32)   # (16, TB)
    h2 = jnp.maximum(h2 + b2, 0.0)

    # Linear(15, 1): VPU multiply + sublane (XLU) reduce, not an N=1 MXU matmul.
    w3c = p_ref[R_W3:R_W3 + HP, 0:1]                            # (16, 1)
    b3 = p_ref[R_B3:R_B3 + 1, 0:1]                              # (1, 1)
    out = jnp.sum(h2 * w3c, axis=0, keepdims=True) + b3         # (1, TB)
    o_ref[...] = out.astype(o_ref.dtype)


def pack_params(params, F):
    """Pack W1^T / W2^T / w3 / b1 / b2 / b3 into one lane-dense f32 slab."""
    C = max(128, _round_up(F, 128))
    slab = jnp.zeros((SLAB_ROWS, C), jnp.float32)
    slab = slab.at[R_W1:R_W1 + H1, 0:F].set(params["w1"].T)     # (10, F)
    slab = slab.at[R_W2:R_W2 + H2, 0:H1].set(params["w2"].T)    # (15, 10)
    slab = slab.at[R_W3:R_W3 + H2, 0:1].set(params["w3"])       # (15, 1)
    slab = slab.at[R_B1:R_B1 + H1, 0:1].set(params["b1"].T)     # (10, 1)
    slab = slab.at[R_B2:R_B2 + H2, 0:1].set(params["b2"].T)     # (15, 1)
    slab = slab.at[R_B3:R_B3 + 1, 0:1].set(params["b3"])        # (1, 1)
    return slab


def house_predict(x, params):
    """x: (B, F) float32.  Returns (B, 1) float32."""
    B, F = x.shape
    slab = pack_params(params, F)
    x = x.astype(jnp.float32)

    # Batch tile: large (amortizes per-step pipeline overhead), lane-dense
    # multiples of 128 once B > 128, and >= 2 blocks so v7x's two TensorCores
    # both get work.  No wrapper padding: Pallas masks the ragged edge block.
    if B <= 128:
        TB = B                                    # single full-extent block
    else:
        TB = min(TB_MAX, _round_up(pl.cdiv(B, 2), 128))
    grid = (pl.cdiv(B, TB),)

    out_t = pl.pallas_call(
        functools.partial(house_predict_kernel, F=F),
        out_shape=jax.ShapeDtypeStruct((1, B), jnp.float32),
        grid=grid,
        in_specs=[
            pl.BlockSpec((TB, F), lambda i: (i, 0)),               # streamed batch tile
            pl.BlockSpec((SLAB_ROWS, slab.shape[1]), lambda i: (0, 0)),  # resident weights
        ],
        out_specs=pl.BlockSpec((1, TB), lambda i: (0, i)),         # lane-dense store
        compiler_params=pltpu.CompilerParams(
            dimension_semantics=("parallel",),                     # 2 TCs on v7x
            vmem_limit_bytes=32 * 1024 * 1024),                    # v5e headroom
    )(x, slab)

    return out_t.T                                                 # back to (B, 1)


def init_params(key, inputs):
    """Deterministic synthetic parameters matching the PyTorch module shapes."""
    ks = jax.random.split(key, 6)

    # PyTorch nn.Linear stores weight as (out, in); we keep (in, out) for x @ W.
    def lin(kw, kb, fan_in, fan_out):
        bound = 1.0 / jnp.sqrt(fan_in)
        w = jax.random.uniform(kw, (fan_in, fan_out), jnp.float32, -bound, bound)
        b = jax.random.uniform(kb, (1, fan_out), jnp.float32, -bound, bound)
        return w, b

    w1, b1 = lin(ks[0], ks[1], inputs, H1)
    w2, b2 = lin(ks[2], ks[3], H1, H2)
    w3, b3 = lin(ks[4], ks[5], H2, 1)
    return {"w1": w1, "b1": b1, "w2": w2, "b2": b2, "w3": w3, "b3": b3}


def reference(x, p):
    h1 = jnp.maximum(x @ p["w1"] + p["b1"], 0.0)
    h2 = jnp.maximum(h1 @ p["w2"] + p["b2"], 0.0)
    return h2 @ p["w3"] + p["b3"]


if __name__ == "__main__":
    key = jax.random.PRNGKey(0)
    k_x, k_p = jax.random.split(key)

    batch, inputs = 16, 8          # small tabular problem: 16 houses, 8 features
    # MinMaxScaler output lies in [0, 1]; emulate that range deterministically.
    x = jax.random.uniform(k_x, (batch, inputs), jnp.float32, 0.0, 1.0)

    params = init_params(k_p, inputs)

    out = house_predict(x, params)
    out = jax.block_until_ready(out)

    ref = reference(x, params)
    assert out.shape == (batch, 1)
    assert jnp.allclose(out, ref, atol=1e-5, rtol=1e-5), "mismatch vs reference"

    print("KERNEL_OK")
</pallas_src>

<mosaic_0001>
module attributes {stable_mosaic.version = 11 : i64} {
  func.func @house_predict_kernel(%arg0: i32, %arg1: memref<16x8xf32, #tpu.memory_space<vmem>>, %arg2: memref<88x128xf32, #tpu.memory_space<vmem>>, %arg3: memref<1x16xf32, #tpu.memory_space<vmem>>) attributes {dimension_semantics = [#tpu.dimension_semantics<parallel>], iteration_bounds = array<i64: 1>, scalar_prefetch = 0 : i64, scratch_operands = 0 : i64, tpu.core_type = #tpu.core_type<tc>, window_params = [{transform_indices = @transform_0, window_bounds = array<i64: 16, 8>}, {pipeline_mode = #tpu.pipeline_mode<synchronous>, transform_indices = @transform_1, window_bounds = array<i64: 88, 128>}, {transform_indices = @transform_2, window_bounds = array<i64: 1, 16>}]} {
    %c0 = arith.constant 0 : index
    %c0_0 = arith.constant 0 : index
    %0 = vector.load %arg1[%c0, %c0_0] : memref<16x8xf32, #tpu.memory_space<vmem>>, vector<16x8xf32>
    %c0_1 = arith.constant 0 : index
    %c0_2 = arith.constant 0 : index
    %1 = vector.load %arg2[%c0_1, %c0_2] : memref<88x128xf32, #tpu.memory_space<vmem>>, vector<16x8xf32>
    %c48 = arith.constant 48 : index
    %c0_3 = arith.constant 0 : index
    %2 = vector.load %arg2[%c48, %c0_3] : memref<88x128xf32, #tpu.memory_space<vmem>>, vector<16x1xf32>
    %cst = arith.constant dense<0.000000e+00> : vector<16x16xf32>
    %3 = tpu.matmul %1, %0, %cst {dimension_numbers = #tpu.dot_dimension_numbers<[1], [1], [0], [0], [0, 0, 1, 0], [], []>} : vector<16x8xf32>, vector<16x8xf32>, vector<16x16xf32> -> vector<16x16xf32>
    %4 = vector.broadcast %2 : vector<16x1xf32> to vector<16x16xf32>
    %5 = arith.addf %3, %4 : vector<16x16xf32>
    %cst_4 = arith.constant 0.000000e+00 : f32
    %6 = vector.broadcast %cst_4 : f32 to vector<16x16xf32>
    %7 = arith.maximumf %5, %6 : vector<16x16xf32>
    %c16 = arith.constant 16 : index
    %c0_5 = arith.constant 0 : index
    %8 = vector.load %arg2[%c16, %c0_5] : memref<88x128xf32, #tpu.memory_space<vmem>>, vector<16x16xf32>
    %c64 = arith.constant 64 : index
    %c0_6 = arith.constant 0 : index
    %9 = vector.load %arg2[%c64, %c0_6] : memref<88x128xf32, #tpu.memory_space<vmem>>, vector<16x1xf32>
    %cst_7 = arith.constant dense<0.000000e+00> : vector<16x16xf32>
    %10 = tpu.matmul %8, %7, %cst_7 {dimension_numbers = #tpu.dot_dimension_numbers<[1], [0], [0], [1], [0, 0, 1, 1], [], []>} : vector<16x16xf32>, vector<16x16xf32>, vector<16x16xf32> -> vector<16x16xf32>
    %11 = vector.broadcast %9 : vector<16x1xf32> to vector<16x16xf32>
    %12 = arith.addf %10, %11 : vector<16x16xf32>
    %cst_8 = arith.constant 0.000000e+00 : f32
    %13 = vector.broadcast %cst_8 : f32 to vector<16x16xf32>
    %14 = arith.maximumf %12, %13 : vector<16x16xf32>
    %c32 = arith.constant 32 : index
    %c0_9 = arith.constant 0 : index
    %15 = vector.load %arg2[%c32, %c0_9] : memref<88x128xf32, #tpu.memory_space<vmem>>, vector<16x1xf32>
    %c80 = arith.constant 80 : index
    %c0_10 = arith.constant 0 : index
    %16 = vector.load %arg2[%c80, %c0_10] : memref<88x128xf32, #tpu.memory_space<vmem>>, vector<1x1xf32>
    %17 = vector.broadcast %15 : vector<16x1xf32> to vector<16x16xf32>
    %18 = arith.mulf %14, %17 : vector<16x16xf32>
    %cst_11 = arith.constant dense<0.000000e+00> : vector<16xf32>
    %19 = vector.multi_reduction <add>, %18, %cst_11 [0] : vector<16x16xf32> to vector<16xf32>
    %20 = vector.shape_cast %19 : vector<16xf32> to vector<1x16xf32>
    %21 = vector.broadcast %16 : vector<1x1xf32> to vector<1x16xf32>
    %22 = arith.addf %20, %21 : vector<1x16xf32>
    %c0_12 = arith.constant 0 : index
    %c0_13 = arith.constant 0 : index
    %23 = vector.load %arg3[%c0_12, %c0_13] : memref<1x16xf32, #tpu.memory_space<vmem>>, vector<1x16xf32>
    tpu.vector_store %arg3[%c0_12, %c0_13], %22 {strides = array<i32>} : memref<1x16xf32, #tpu.memory_space<vmem>>, vector<1x16xf32>,
    return
  }
  func.func @transform_0(%arg0: i32) -> (i32, i32) {
    %c0_i32 = arith.constant 0 : i32
    %c0_i32_0 = arith.constant 0 : i32
    return %arg0, %c0_i32 : i32, i32
  }
  func.func @transform_1(%arg0: i32) -> (i32, i32) {
    %c0_i32 = arith.constant 0 : i32
    %c0_i32_0 = arith.constant 0 : i32
    %c0_i32_1 = arith.constant 0 : i32
    return %c0_i32, %c0_i32_0 : i32, i32
  }
  func.func @transform_2(%arg0: i32) -> (i32, i32) {
    %c0_i32 = arith.constant 0 : i32
    %c0_i32_0 = arith.constant 0 : i32
    return %c0_i32, %arg0 : i32, i32
  }
}

</mosaic_0001>

<bundles_post_ra>
// kernel: tpu_custom_call.1
= control target key start
LH: loop header
LB: loop body
LE: loop exit
PB: predicated region body
PF: predicated region fallthrough
CT: control target
= control target key end

     0   :  { %7 = vsyncpa [#allocation3], 0  ;;  %s283_s0 = inlined_call_operand.vmem [shape: f32[16,8], index: 0, kind: input, shape index: {}]   ;;  %s284_s1 = inlined_call_operand.hbm [shape: f32[88,128], index: 1, kind: input, shape index: {}]   ;;  %s285_s2 = inlined_call_operand.hbm [shape: f32[1,16], index: 2, kind: output, shape index: {}]  }
   0x1   :  { %8 = vsyncpa [#allocation4], 0  ;;  %s15_s11 = sshll.u32 %s284_s1, 4  ;;  %s247_s12 = smov [#allocation2]   ;;  %s16_s11 = int_to_ptr.hbm [resolvable:$true] %s15_s11 }
   0x2   :  { %s17_s13 = sshll.u32 %s247_s12, 4  ;;  %s248_s14 = smov 128   ;;  %s18_s13 = int_to_ptr.vmem [resolvable:$true] %s17_s13 }
   0x3   :  { %s249_s15 = smov 8  }
   0x4   :  { %23 = dma.hbm_to_vmem [thread:$0]  %s16_s11, 1408, %s18_s13, [#allocation3], %s248_s14, %s248_s14, %s249_s15  }
   0x5   :  { %243 = dma.done.wait [#allocation3], 1408  }
   0x6   :  { %244 = vsyncadd [#allocation3], 4294965888  ;;  %v250_v0 = vmov 0   ;;  %vm44_vm0 = vcmask 64512   ;;  %v29_v1 = vld [vmem:[%s283_s0 + $0x8] sm:$0xff]  ;;  %v33_v2 = vld [vmem:[#allocation2 + $0x38] sm:$0xff] }
   0x7   :  { %192 = vset.pattern.permute.xlu0 %v250_v0  ;;  %193 = vset.pattern.permute.xlu1 %v250_v0  ;;  %v28_v3 = vld [vmem:[%s283_s0] sm:$0xff]  ;;  %v31_v5 = vld [vmem:[#allocation2 + $0x8] sm:$0xff]  ;;  %v32_v6 = vld [vmem:[#allocation2 + $0x30] sm:$0xff]  ;;  %vm96_vm1 = vcmask 130048   ;;  %s251_s0 = smov [#allocation5]   ;;  %s167_s22 = sshll.u32 %s285_s2, 4  ;;  %s168_s22 = int_to_ptr.hbm [resolvable:$true] %s167_s22 }
   0x8   :  { %194 = vset.pattern.permute.xlu2 %v250_v0  ;;  %177 = vmatpush.xpose.msk.msra.mxu0 %vm44_vm0, %v29_v1  ;;  %v30_v4 = vld [vmem:[#allocation2] sm:$0xff]  ;;  %v130_v7 = vld [vmem:[#allocation2 + $0x50] sm:$0x1]  ;;  %v85_v10 = vld [vmem:[#allocation2 + $0x48] sm:$0xff]  ;;  %s165_s19 = sshll.u32 %s251_s0, 4  ;;  %vm158_vm2 = vcmask 122880   ;;  %s166_s19 = int_to_ptr.vmem [resolvable:$true] %s165_s19 }
   0x9   :  { %183 = vmatpush.xpose.msk.msra.mxu2 %vm44_vm0, %v29_v1  ;;  %41 = vperm.xlu0 %192, %v33_v2   ;;  %v84_v8 = vld [vmem:[#allocation2 + $0x40] sm:$0xff]  ;;  %v129_v11 = vld [vmem:[#allocation2 + $0x28] sm:$0xff]  ;;  %v82_v20 = vld [vmem:[#allocation2 + $0x10] sm:$0xff] }
   0xa   :  { %v128_v9 = vld [vmem:[#allocation2 + $0x20] sm:$0xff]  ;;  %88 = vperm.xlu1 %193, %v84_v8   ;;  %v83_v21 = vld [vmem:[#allocation2 + $0x18] sm:$0xff] }
   0xb   :  { %133 = vperm.xlu2 %194, %v128_v9  }
   0xc   :  { %178 = vmatpush.xpose.msk.msra.mxu0 %vm44_vm0, %v28_v3 }
   0xd   :  { %184 = vmatpush.xpose.msk.msra.mxu2 %vm44_vm0, %v28_v3 }
   0xf   :  { %179 = vmatmul.msk.f32.vlgmr.msra.gmra.mxu0 %vm44_vm0, %v30_v4 }
  0x10   :  { %180 = vmatmul.msk.f32.vlgmr.msra.gmra.mxu2 %vm44_vm0, %v31_v5 }
  0x11   :  { %36 = vperm.xlu0 %192, %v32_v6  }
  0x12   :  { %93 = vperm.xlu1 %193, %v85_v10  }
  0x13   :  { %138 = vperm.xlu2 %194, %v129_v11  }
  0x19   :  { %154 = vperm.xlu0 %192, %v130_v7  }
  0x65   :  { %v134_v23 = vpop.permute.xlu2 %133 }
  0x6d   :  { %v139_v32 = vpop.permute.xlu2 %138 }
  0x7b   :  { %v42_v12 = vpop.permute.xlu0 %41 }
  0x7c   :  { %v89_v22 = vpop.permute.xlu1 %88 }
  0x83   :  { %v37_v14 = vpop.permute.xlu0 %36 }
  0x84   :  { %v94_v27 = vpop.permute.xlu1 %93 }
  0x8b   :  { %v155_v43 = vpop.permute.xlu0 %154 }
  0x8c   :  { %v74_v13 = vpop.f32.mrf.mxu0 }
  0x8d   :  { %v75_v16 = vadd.f32 %v74_v13, %v37_v14 }
  0x8f   :  { %v80_v19 = vmax.f32 %v75_v16, 0.0 }
  0x93   :  { %v77_v15 = vpop.f32.mrf.mxu2 }
  0x94   :  { %v78_v17 = vadd.f32 %v77_v15, %v42_v12 }
  0x96   :  { %v81_v18 = vmax.f32 %v78_v17, 0.0 }
  0x98   :  { %117 = vmatpush.msra.mxu1 %v81_v18  ;;  %185 = vmatpush.msra.mxu3 %v81_v18 }
  0x9a   :  { %118 = vmatpush.msra.mxu1 %v80_v19  ;;  %186 = vmatpush.msra.mxu3 %v80_v19 }
  0x9b   :  { %181 = vmatmul.msk.f32.vlgmr.msra.gmra.mxu1 %vm96_vm1, %v82_v20  ;;  %182 = vmatmul.msk.f32.vlgmr.msra.gmra.mxu3 %vm96_vm1, %v83_v21 }
 0x118   :  { %v120_v24 = vpop.f32.mrf.mxu1 }
 0x119   :  { %v121_v25 = vadd.f32 %v120_v24, %v89_v22 }
 0x11b   :  { %v126_v26 = vmax.f32 %v121_v25, 0.0 }
 0x11d   :  { %v141_v30 = vmul.f32 %v134_v23, %v126_v26 }
 0x11e   :  { %v123_v28 = vpop.f32.mrf.mxu3 }
 0x11f   :  { %v124_v29 = vadd.f32 %v123_v28, %v94_v27  ;;  %v143_v34 = vsel %vm96_vm1, %v141_v30, 0.0 }
 0x121   :  { %v127_v31 = vmax.f32 %v124_v29, 0.0 }
 0x123   :  { %v142_v33 = vmul.f32 %v139_v32, %v127_v31 }
 0x125   :  { %v144_v35 = vsel %vm96_vm1, %v142_v33, 0.0 }
 0x126   :  { %v145_v36 = vadd.f32 %v144_v35, %v143_v34 }
 0x128   :  { %v146_v37 = vrot.slane %v145_v36, 4 }
 0x12a   :  { %v147_v38 = vadd.f32 %v146_v37, %v145_v36 }
 0x12c   :  { %v148_v39 = vrot.slane %v147_v38, 2 }
 0x12e   :  { %v149_v40 = vadd.f32 %v148_v39, %v147_v38 }
 0x130   :  { %v150_v41 = vrot.slane %v149_v40, 1 }
 0x132   :  { %v151_v42 = vadd.f32 %v150_v41, %v149_v40 }
 0x134   :  { %v157_v44 = vadd.f32 %v155_v43, %v151_v42 }
 0x136   :  { %159 = vst.msk [vmem:[#allocation5] sm:$0x1] %vm158_vm2, %v157_v44 }
 0x137   :  { %170 = dma.vmem_to_hbm [thread:$0]  %s166_s19, 16, %s168_s22, [#allocation4]  }
 0x138   :  { %245 = dma.done.wait [#allocation4], 16  }
 0x139   :  { %246 = vsyncadd [#allocation4], 4294967280 }
 0x13a   :  { %175 = vsyncpa [#allocation3], 1 }
 0x13b   :  { %176 = vsyncpa [#allocation4], 1 }

</bundles_post_ra>
